<compile_context>
chip_gen: v7x
topology: tpu7x:2x2x1
jax: 0.10.0
libtpu: 0.0.40
codegen_flags: <defaults>
</compile_context>

<pallas_src>
import functools

import jax
import jax.numpy as jnp
from jax.experimental import pallas as pl
from jax.experimental.pallas import tpu as pltpu

EMBED_DIM = 32     # opt['embed']['embed_dim']
DROPOUT_P = 0.1    # opt['embed']['share_dropout']

IMG_C, IMG_H, IMG_W = 4, 16, 16
IMG_FLAT = IMG_C * IMG_H * IMG_W
TEXT_SEQ, TEXT_DIM = 8, 32
AUDIO_DIM = 64


def _vmem():
    return pl.BlockSpec(memory_space=pltpu.MemorySpace.VMEM)


# --------------------------- fused Pallas kernel -----------------------------

def _mcrn_fused_kernel(
    img_ref, txt_ref, aud_ref,                 # inputs (already flattened / pooled)
    wv_ref, bv_ref, wt_ref, bt_ref, wa_ref, ba_ref,   # encoder params
    ws_ref, bs_ref,                            # shared SPTM params
    uv_ref, ut_ref, ua_ref,                    # uniform [0,1) variates for dropout
    svt_ref, sva_ref, gv_ref, gt_ref, ga_ref,  # outputs
    *, p,
):
    scale = 1.0 / (1.0 - p)

    def encode(x, w, b, u):
        # linear encoder (+ReLU) followed by torch.dropout(train=True)
        y = jnp.dot(x, w, preferred_element_type=jnp.float32) + b
        y = jnp.maximum(y, 0.0)
        return jnp.where(u >= p, y * scale, 0.0)

    fv = encode(img_ref[...], wv_ref[...], bv_ref[...], uv_ref[...])
    ft = encode(txt_ref[...], wt_ref[...], bt_ref[...], ut_ref[...])
    fa = encode(aud_ref[...], wa_ref[...], ba_ref[...], ua_ref[...])

    # shared projection (MCRN_SPTM) with the same weights on all modalities
    ws = ws_ref[...]
    bs = bs_ref[...]
    gv = jnp.dot(fv, ws, preferred_element_type=jnp.float32) + bs
    gt = jnp.dot(ft, ws, preferred_element_type=jnp.float32) + bs
    ga = jnp.dot(fa, ws, preferred_element_type=jnp.float32) + bs

    # l2norm exactly as in the PyTorch reference: x / (sqrt(sum(x^2)) + eps)
    eps = 1e-8

    def l2n(x):
        return x / (jnp.sqrt(jnp.sum(x * x, axis=-1, keepdims=True)) + eps)

    gvn = l2n(gv)
    gtn = l2n(gt)
    gan = l2n(ga)

    # cosine similarity: contract the last axes directly (no explicit .T)
    svt_ref[...] = jax.lax.dot_general(
        gvn, gtn, (((1,), (1,)), ((), ())), preferred_element_type=jnp.float32)
    sva_ref[...] = jax.lax.dot_general(
        gvn, gan, (((1,), (1,)), ((), ())), preferred_element_type=jnp.float32)

    gv_ref[...] = gv
    gt_ref[...] = gt
    ga_ref[...] = ga


# ----------------------------- JAX wrapper -----------------------------------

def init_params(key):
    ks = jax.random.split(key, 4)

    def w(k, shape):
        return (jax.random.normal(k, shape, jnp.float32)
                / jnp.sqrt(shape[0])).astype(jnp.float32)

    return {
        "Wv": w(ks[0], (IMG_FLAT, EMBED_DIM)),
        "bv": jnp.zeros((EMBED_DIM,), jnp.float32),
        "Wt": w(ks[1], (TEXT_DIM, EMBED_DIM)),
        "bt": jnp.zeros((EMBED_DIM,), jnp.float32),
        "Wa": w(ks[2], (AUDIO_DIM, EMBED_DIM)),
        "ba": jnp.zeros((EMBED_DIM,), jnp.float32),
        # shared SPTM projection (same weights applied to all three modalities)
        "Ws": w(ks[3], (EMBED_DIM, EMBED_DIM)),
        "bs": jnp.zeros((EMBED_DIM,), jnp.float32),
    }


@functools.partial(jax.jit, static_argnames=())
def mcrn_finetune_forward(img, text, audio, params, dropout_key):
    bv = img.shape[0]
    bt = text.shape[0]
    ba = audio.shape[0]

    # plain-JAX glue: NCHW flatten + text mean-pooling + dropout uniforms
    img_flat = img.reshape(bv, -1)
    txt_pooled = jnp.mean(text, axis=1)
    kv, kt, ka = jax.random.split(dropout_key, 3)
    uv = jax.random.uniform(kv, (bv, EMBED_DIM), jnp.float32)
    ut = jax.random.uniform(kt, (bt, EMBED_DIM), jnp.float32)
    ua = jax.random.uniform(ka, (ba, EMBED_DIM), jnp.float32)

    out_shapes = (
        jax.ShapeDtypeStruct((bv, bt), jnp.float32),        # score_vt
        jax.ShapeDtypeStruct((bv, ba), jnp.float32),        # score_va
        jax.ShapeDtypeStruct((bv, EMBED_DIM), jnp.float32),  # gv
        jax.ShapeDtypeStruct((bt, EMBED_DIM), jnp.float32),  # gt
        jax.ShapeDtypeStruct((ba, EMBED_DIM), jnp.float32),  # ga
    )

    svt, sva, gv, gt, ga = pl.pallas_call(
        functools.partial(_mcrn_fused_kernel, p=DROPOUT_P),
        out_shape=out_shapes,
        in_specs=[_vmem()] * 14,
        out_specs=(_vmem(),) * 5,
    )(
        img_flat, txt_pooled, audio,
        params["Wv"], params["bv"].reshape(1, EMBED_DIM),
        params["Wt"], params["bt"].reshape(1, EMBED_DIM),
        params["Wa"], params["ba"].reshape(1, EMBED_DIM),
        params["Ws"], params["bs"].reshape(1, EMBED_DIM),
        uv, ut, ua,
    )
    return [svt, sva], [gv, gt, ga]


if __name__ == "__main__":
    key = jax.random.PRNGKey(0)
    kp, ki, kt, ka, kd = jax.random.split(key, 5)
    params = init_params(kp)

    img = jax.random.normal(ki, (4, IMG_C, IMG_H, IMG_W), jnp.float32)   # NCHW
    text = jax.random.normal(kt, (3, TEXT_SEQ, TEXT_DIM), jnp.float32)
    audio = jax.random.normal(ka, (5, AUDIO_DIM), jnp.float32)

    scores, embeds = mcrn_finetune_forward(img, text, audio, params, kd)
    for arr in scores + embeds:
        jax.block_until_ready(arr)

    assert scores[0].shape == (4, 3)
    assert scores[1].shape == (4, 5)
    assert embeds[0].shape == (4, EMBED_DIM)
    assert embeds[1].shape == (3, EMBED_DIM)
    assert embeds[2].shape == (5, EMBED_DIM)
    assert all(bool(jnp.all(jnp.isfinite(a))) for a in scores + embeds)
    # cosine similarities must lie in [-1, 1] (+ tiny fp slack)
    assert bool(jnp.all(jnp.abs(scores[0]) <= 1.0 + 1e-5))
    assert bool(jnp.all(jnp.abs(scores[1]) <= 1.0 + 1e-5))
    print("KERNEL_OK")
</pallas_src>

<mosaic_0001>
module attributes {stable_mosaic.version = 11 : i64} {
  func.func @_mcrn_fused_kernel(%arg0: memref<4x1024xf32, #tpu.memory_space<vmem>>, %arg1: memref<3x32xf32, #tpu.memory_space<vmem>>, %arg2: memref<5x64xf32, #tpu.memory_space<vmem>>, %arg3: memref<1024x32xf32, #tpu.memory_space<vmem>>, %arg4: memref<1x32xf32, #tpu.memory_space<vmem>>, %arg5: memref<32x32xf32, #tpu.memory_space<vmem>>, %arg6: memref<1x32xf32, #tpu.memory_space<vmem>>, %arg7: memref<64x32xf32, #tpu.memory_space<vmem>>, %arg8: memref<1x32xf32, #tpu.memory_space<vmem>>, %arg9: memref<32x32xf32, #tpu.memory_space<vmem>>, %arg10: memref<1x32xf32, #tpu.memory_space<vmem>>, %arg11: memref<4x32xf32, #tpu.memory_space<vmem>>, %arg12: memref<3x32xf32, #tpu.memory_space<vmem>>, %arg13: memref<5x32xf32, #tpu.memory_space<vmem>>, %arg14: memref<4x3xf32, #tpu.memory_space<vmem>>, %arg15: memref<4x5xf32, #tpu.memory_space<vmem>>, %arg16: memref<4x32xf32, #tpu.memory_space<vmem>>, %arg17: memref<3x32xf32, #tpu.memory_space<vmem>>, %arg18: memref<5x32xf32, #tpu.memory_space<vmem>>) attributes {dimension_semantics = [], scalar_prefetch = 0 : i64, scratch_operands = 0 : i64, tpu.core_type = #tpu.core_type<tc>} {
    %c0 = arith.constant 0 : index
    %c0_0 = arith.constant 0 : index
    %0 = vector.load %arg0[%c0, %c0_0] : memref<4x1024xf32, #tpu.memory_space<vmem>>, vector<4x1024xf32>
    %c0_1 = arith.constant 0 : index
    %c0_2 = arith.constant 0 : index
    %1 = vector.load %arg3[%c0_1, %c0_2] : memref<1024x32xf32, #tpu.memory_space<vmem>>, vector<1024x32xf32>
    %c0_3 = arith.constant 0 : index
    %c0_4 = arith.constant 0 : index
    %2 = vector.load %arg4[%c0_3, %c0_4] : memref<1x32xf32, #tpu.memory_space<vmem>>, vector<1x32xf32>
    %c0_5 = arith.constant 0 : index
    %c0_6 = arith.constant 0 : index
    %3 = vector.load %arg11[%c0_5, %c0_6] : memref<4x32xf32, #tpu.memory_space<vmem>>, vector<4x32xf32>
    %cst = arith.constant dense<0.000000e+00> : vector<4x32xf32>
    %4 = tpu.matmul %0, %1, %cst {dimension_numbers = #tpu.dot_dimension_numbers<[1], [0], [0], [1], [0, 0, 1, 1], [], []>} : vector<4x1024xf32>, vector<1024x32xf32>, vector<4x32xf32> -> vector<4x32xf32>
    %5 = vector.broadcast %2 : vector<1x32xf32> to vector<4x32xf32>
    %6 = arith.addf %4, %5 : vector<4x32xf32>
    %cst_7 = arith.constant 0.000000e+00 : f32
    %7 = vector.broadcast %cst_7 : f32 to vector<4x32xf32>
    %8 = arith.maximumf %6, %7 : vector<4x32xf32>
    %cst_8 = arith.constant 1.000000e-01 : f32
    %9 = vector.broadcast %cst_8 : f32 to vector<4x32xf32>
    %10 = arith.cmpf oge, %3, %9 : vector<4x32xf32>
    %cst_9 = arith.constant 1.11111116 : f32
    %11 = vector.broadcast %cst_9 : f32 to vector<4x32xf32>
    %12 = arith.mulf %8, %11 : vector<4x32xf32>
    %cst_10 = arith.constant 0.000000e+00 : f32
    %13 = vector.broadcast %cst_10 : f32 to vector<4x32xf32>
    %14 = arith.select %10, %12, %13 : vector<4x32xi1>, vector<4x32xf32>
    %c0_11 = arith.constant 0 : index
    %c0_12 = arith.constant 0 : index
    %15 = vector.load %arg1[%c0_11, %c0_12] : memref<3x32xf32, #tpu.memory_space<vmem>>, vector<3x32xf32>
    %c0_13 = arith.constant 0 : index
    %c0_14 = arith.constant 0 : index
    %16 = vector.load %arg5[%c0_13, %c0_14] : memref<32x32xf32, #tpu.memory_space<vmem>>, vector<32x32xf32>
    %c0_15 = arith.constant 0 : index
    %c0_16 = arith.constant 0 : index
    %17 = vector.load %arg6[%c0_15, %c0_16] : memref<1x32xf32, #tpu.memory_space<vmem>>, vector<1x32xf32>
    %c0_17 = arith.constant 0 : index
    %c0_18 = arith.constant 0 : index
    %18 = vector.load %arg12[%c0_17, %c0_18] : memref<3x32xf32, #tpu.memory_space<vmem>>, vector<3x32xf32>
    %cst_19 = arith.constant dense<0.000000e+00> : vector<3x32xf32>
    %19 = tpu.matmul %15, %16, %cst_19 {dimension_numbers = #tpu.dot_dimension_numbers<[1], [0], [0], [1], [0, 0, 1, 1], [], []>} : vector<3x32xf32>, vector<32x32xf32>, vector<3x32xf32> -> vector<3x32xf32>
    %20 = vector.broadcast %17 : vector<1x32xf32> to vector<3x32xf32>
    %21 = arith.addf %19, %20 : vector<3x32xf32>
    %cst_20 = arith.constant 0.000000e+00 : f32
    %22 = vector.broadcast %cst_20 : f32 to vector<3x32xf32>
    %23 = arith.maximumf %21, %22 : vector<3x32xf32>
    %cst_21 = arith.constant 1.000000e-01 : f32
    %24 = vector.broadcast %cst_21 : f32 to vector<3x32xf32>
    %25 = arith.cmpf oge, %18, %24 : vector<3x32xf32>
    %cst_22 = arith.constant 1.11111116 : f32
    %26 = vector.broadcast %cst_22 : f32 to vector<3x32xf32>
    %27 = arith.mulf %23, %26 : vector<3x32xf32>
    %cst_23 = arith.constant 0.000000e+00 : f32
    %28 = vector.broadcast %cst_23 : f32 to vector<3x32xf32>
    %29 = arith.select %25, %27, %28 : vector<3x32xi1>, vector<3x32xf32>
    %c0_24 = arith.constant 0 : index
    %c0_25 = arith.constant 0 : index
    %30 = vector.load %arg2[%c0_24, %c0_25] : memref<5x64xf32, #tpu.memory_space<vmem>>, vector<5x64xf32>
    %c0_26 = arith.constant 0 : index
    %c0_27 = arith.constant 0 : index
    %31 = vector.load %arg7[%c0_26, %c0_27] : memref<64x32xf32, #tpu.memory_space<vmem>>, vector<64x32xf32>
    %c0_28 = arith.constant 0 : index
    %c0_29 = arith.constant 0 : index
    %32 = vector.load %arg8[%c0_28, %c0_29] : memref<1x32xf32, #tpu.memory_space<vmem>>, vector<1x32xf32>
    %c0_30 = arith.constant 0 : index
    %c0_31 = arith.constant 0 : index
    %33 = vector.load %arg13[%c0_30, %c0_31] : memref<5x32xf32, #tpu.memory_space<vmem>>, vector<5x32xf32>
    %cst_32 = arith.constant dense<0.000000e+00> : vector<5x32xf32>
    %34 = tpu.matmul %30, %31, %cst_32 {dimension_numbers = #tpu.dot_dimension_numbers<[1], [0], [0], [1], [0, 0, 1, 1], [], []>} : vector<5x64xf32>, vector<64x32xf32>, vector<5x32xf32> -> vector<5x32xf32>
    %35 = vector.broadcast %32 : vector<1x32xf32> to vector<5x32xf32>
    %36 = arith.addf %34, %35 : vector<5x32xf32>
    %cst_33 = arith.constant 0.000000e+00 : f32
    %37 = vector.broadcast %cst_33 : f32 to vector<5x32xf32>
    %38 = arith.maximumf %36, %37 : vector<5x32xf32>
    %cst_34 = arith.constant 1.000000e-01 : f32
    %39 = vector.broadcast %cst_34 : f32 to vector<5x32xf32>
    %40 = arith.cmpf oge, %33, %39 : vector<5x32xf32>
    %cst_35 = arith.constant 1.11111116 : f32
    %41 = vector.broadcast %cst_35 : f32 to vector<5x32xf32>
    %42 = arith.mulf %38, %41 : vector<5x32xf32>
    %cst_36 = arith.constant 0.000000e+00 : f32
    %43 = vector.broadcast %cst_36 : f32 to vector<5x32xf32>
    %44 = arith.select %40, %42, %43 : vector<5x32xi1>, vector<5x32xf32>
    %c0_37 = arith.constant 0 : index
    %c0_38 = arith.constant 0 : index
    %45 = vector.load %arg9[%c0_37, %c0_38] : memref<32x32xf32, #tpu.memory_space<vmem>>, vector<32x32xf32>
    %c0_39 = arith.constant 0 : index
    %c0_40 = arith.constant 0 : index
    %46 = vector.load %arg10[%c0_39, %c0_40] : memref<1x32xf32, #tpu.memory_space<vmem>>, vector<1x32xf32>
    %cst_41 = arith.constant dense<0.000000e+00> : vector<4x32xf32>
    %47 = tpu.matmul %14, %45, %cst_41 {dimension_numbers = #tpu.dot_dimension_numbers<[1], [0], [0], [1], [0, 0, 1, 1], [], []>} : vector<4x32xf32>, vector<32x32xf32>, vector<4x32xf32> -> vector<4x32xf32>
    %48 = vector.broadcast %46 : vector<1x32xf32> to vector<4x32xf32>
    %49 = arith.addf %47, %48 : vector<4x32xf32>
    %cst_42 = arith.constant dense<0.000000e+00> : vector<3x32xf32>
    %50 = tpu.matmul %29, %45, %cst_42 {dimension_numbers = #tpu.dot_dimension_numbers<[1], [0], [0], [1], [0, 0, 1, 1], [], []>} : vector<3x32xf32>, vector<32x32xf32>, vector<3x32xf32> -> vector<3x32xf32>
    %51 = vector.broadcast %46 : vector<1x32xf32> to vector<3x32xf32>
    %52 = arith.addf %50, %51 : vector<3x32xf32>
    %cst_43 = arith.constant dense<0.000000e+00> : vector<5x32xf32>
    %53 = tpu.matmul %44, %45, %cst_43 {dimension_numbers = #tpu.dot_dimension_numbers<[1], [0], [0], [1], [0, 0, 1, 1], [], []>} : vector<5x32xf32>, vector<32x32xf32>, vector<5x32xf32> -> vector<5x32xf32>
    %54 = vector.broadcast %46 : vector<1x32xf32> to vector<5x32xf32>
    %55 = arith.addf %53, %54 : vector<5x32xf32>
    %56 = arith.mulf %49, %49 : vector<4x32xf32>
    %cst_44 = arith.constant dense<0.000000e+00> : vector<4xf32>
    %57 = vector.multi_reduction <add>, %56, %cst_44 [1] : vector<4x32xf32> to vector<4xf32>
    %58 = vector.shape_cast %57 : vector<4xf32> to vector<4x1xf32>
    %59 = math.sqrt %58 : vector<4x1xf32>
    %cst_45 = arith.constant 9.99999993E-9 : f32
    %60 = vector.broadcast %cst_45 : f32 to vector<4x1xf32>
    %61 = arith.addf %59, %60 : vector<4x1xf32>
    %62 = vector.broadcast %61 : vector<4x1xf32> to vector<4x32xf32>
    %63 = arith.divf %49, %62 : vector<4x32xf32>
    %64 = arith.mulf %52, %52 : vector<3x32xf32>
    %cst_46 = arith.constant dense<0.000000e+00> : vector<3xf32>
    %65 = vector.multi_reduction <add>, %64, %cst_46 [1] : vector<3x32xf32> to vector<3xf32>
    %66 = vector.shape_cast %65 : vector<3xf32> to vector<3x1xf32>
    %67 = math.sqrt %66 : vector<3x1xf32>
    %cst_47 = arith.constant 9.99999993E-9 : f32
    %68 = vector.broadcast %cst_47 : f32 to vector<3x1xf32>
    %69 = arith.addf %67, %68 : vector<3x1xf32>
    %70 = vector.broadcast %69 : vector<3x1xf32> to vector<3x32xf32>
    %71 = arith.divf %52, %70 : vector<3x32xf32>
    %72 = arith.mulf %55, %55 : vector<5x32xf32>
    %cst_48 = arith.constant dense<0.000000e+00> : vector<5xf32>
    %73 = vector.multi_reduction <add>, %72, %cst_48 [1] : vector<5x32xf32> to vector<5xf32>
    %74 = vector.shape_cast %73 : vector<5xf32> to vector<5x1xf32>
    %75 = math.sqrt %74 : vector<5x1xf32>
    %cst_49 = arith.constant 9.99999993E-9 : f32
    %76 = vector.broadcast %cst_49 : f32 to vector<5x1xf32>
    %77 = arith.addf %75, %76 : vector<5x1xf32>
    %78 = vector.broadcast %77 : vector<5x1xf32> to vector<5x32xf32>
    %79 = arith.divf %55, %78 : vector<5x32xf32>
    %cst_50 = arith.constant dense<0.000000e+00> : vector<4x3xf32>
    %80 = tpu.matmul %63, %71, %cst_50 {dimension_numbers = #tpu.dot_dimension_numbers<[1], [1], [0], [0], [0, 0, 1, 0], [], []>} : vector<4x32xf32>, vector<3x32xf32>, vector<4x3xf32> -> vector<4x3xf32>
    %c0_51 = arith.constant 0 : index
    %c0_52 = arith.constant 0 : index
    %81 = vector.load %arg14[%c0_51, %c0_52] : memref<4x3xf32, #tpu.memory_space<vmem>>, vector<4x3xf32>
    tpu.vector_store %arg14[%c0_51, %c0_52], %80 {strides = array<i32>} : memref<4x3xf32, #tpu.memory_space<vmem>>, vector<4x3xf32>,
    %cst_53 = arith.constant dense<0.000000e+00> : vector<4x5xf32>
    %82 = tpu.matmul %63, %79, %cst_53 {dimension_numbers = #tpu.dot_dimension_numbers<[1], [1], [0], [0], [0, 0, 1, 0], [], []>} : vector<4x32xf32>, vector<5x32xf32>, vector<4x5xf32> -> vector<4x5xf32>
    %c0_54 = arith.constant 0 : index
    %c0_55 = arith.constant 0 : index
    %83 = vector.load %arg15[%c0_54, %c0_55] : memref<4x5xf32, #tpu.memory_space<vmem>>, vector<4x5xf32>
    tpu.vector_store %arg15[%c0_54, %c0_55], %82 {strides = array<i32>} : memref<4x5xf32, #tpu.memory_space<vmem>>, vector<4x5xf32>,
    %c0_56 = arith.constant 0 : index
    %c0_57 = arith.constant 0 : index
    %84 = vector.load %arg16[%c0_56, %c0_57] : memref<4x32xf32, #tpu.memory_space<vmem>>, vector<4x32xf32>
    tpu.vector_store %arg16[%c0_56, %c0_57], %49 {strides = array<i32>} : memref<4x32xf32, #tpu.memory_space<vmem>>, vector<4x32xf32>,
    %c0_58 = arith.constant 0 : index
    %c0_59 = arith.constant 0 : index
    %85 = vector.load %arg17[%c0_58, %c0_59] : memref<3x32xf32, #tpu.memory_space<vmem>>, vector<3x32xf32>
    tpu.vector_store %arg17[%c0_58, %c0_59], %52 {strides = array<i32>} : memref<3x32xf32, #tpu.memory_space<vmem>>, vector<3x32xf32>,
    %c0_60 = arith.constant 0 : index
    %c0_61 = arith.constant 0 : index
    %86 = vector.load %arg18[%c0_60, %c0_61] : memref<5x32xf32, #tpu.memory_space<vmem>>, vector<5x32xf32>
    tpu.vector_store %arg18[%c0_60, %c0_61], %55 {strides = array<i32>} : memref<5x32xf32, #tpu.memory_space<vmem>>, vector<5x32xf32>,
    return
  }
}

</mosaic_0001>

<bundles_post_ra>
// kernel: mcrn_finetune_forward.3
= control target key start
LH: loop header
LB: loop body
LE: loop exit
PB: predicated region body
PF: predicated region fallthrough
CT: control target
= control target key end

     0   :  { %s2434_s0 = inlined_call_operand.vmem [shape: f32[4,1024], index: 0, kind: input, shape index: {}]   ;;  %s2435_s1 = inlined_call_operand.vmem [shape: f32[3,32], index: 1, kind: input, shape index: {}]   ;;  %s2436_s2 = inlined_call_operand.vmem [shape: f32[5,64], index: 2, kind: input, shape index: {}]   ;;  %s2437_s3 = inlined_call_operand.vmem [shape: f32[1024,32], index: 3, kind: input, shape index: {}]   ;;  %s2438_s4 = inlined_call_operand.vmem [shape: f32[1,32], index: 4, kind: input, shape index: {}]   ;;  %s2439_s5 = inlined_call_operand.vmem [shape: f32[32,32], index: 5, kind: input, shape index: {}]   ;;  %s2440_s6 = inlined_call_operand.vmem [shape: f32[1,32], index: 6, kind: input, shape index: {}]   ;;  %s2441_s7 = inlined_call_operand.vmem [shape: f32[64,32], index: 7, kind: input, shape index: {}]   ;;  %s2442_s8 = inlined_call_operand.vmem [shape: f32[1,32], index: 8, kind: input, shape index: {}]   ;;  %s2443_s9 = inlined_call_operand.vmem [shape: f32[32,32], index: 9, kind: input, shape index: {}]   ;;  %s2444_s10 = inlined_call_operand.vmem [shape: f32[1,32], index: 10, kind: input, shape index: {}]   ;;  %s2445_s11 = inlined_call_operand.vmem [shape: f32[4,32], index: 11, kind: input, shape index: {}]   ;;  %s2446_s12 = inlined_call_operand.vmem [shape: f32[3,32], index: 12, kind: input, shape index: {}]   ;;  %s2447_s13 = inlined_call_operand.vmem [shape: f32[5,32], index: 13, kind: input, shape index: {}]   ;;  %s2448_s14 = inlined_call_operand.hbm [shape: f32[4,3], index: 14, kind: output, shape index: {0}]   ;;  %s2449_s15 = inlined_call_operand.hbm [shape: f32[4,5], index: 15, kind: output, shape index: {1}]   ;;  %s2450_s16 = inlined_call_operand.hbm [shape: f32[4,32], index: 16, kind: output, shape index: {2}]   ;;  %s2451_s17 = inlined_call_operand.hbm [shape: f32[3,32], index: 17, kind: output, shape index: {3}]   ;;  %s2452_s18 = inlined_call_operand.hbm [shape: f32[5,32], index: 18, kind: output, shape index: {4}]  }
   0x1   :  { %2454 = sst [smem:[#allocation13_spill]] %s2434_s0 }
   0x2   :  { %2455 = sst [smem:[#allocation14_spill]] %s2435_s1 }
   0x3   :  { %2456 = sst [smem:[#allocation15_spill]] %s2436_s2 }
   0x4   :  { %24 = vsyncpa [#allocation3], 0 }
   0x5   :  { %25 = vsyncpa [#allocation5], 0  ;;  %v75_v0 = vld [vmem:[%s2437_s3 + $0x80] sm:$0xff]  ;;  %v76_v1 = vld [vmem:[%s2437_s3 + $0x88] sm:$0xff]  ;;  %s2457_s20 = sld [smem:[#allocation13_spill]] }
   0x6   :  { %v107_v2 = vld [vmem:[%s2437_s3 + $0x180] sm:$0xff]  ;;  %v1435_v3 = vpack.c.bf16 %v76_v1, %v75_v0  ;;  %v108_v4 = vld [vmem:[%s2437_s3 + $0x188] sm:$0xff]  ;;  %v77_v11 = vld [vmem:[%s2437_s3 + $0x90] sm:$0xff] }
   0x7   :  { %v59_v5 = vld [vmem:[%s2437_s3] sm:$0xff]  ;;  %v60_v6 = vld [vmem:[%s2437_s3 + $0x8] sm:$0xff]  ;;  %v1467_v7 = vpack.c.bf16 %v108_v4, %v107_v2  ;;  %v78_v13 = vld [vmem:[%s2437_s3 + $0x98] sm:$0xff] }
   0x8   :  { %v1437_v8 = vpack.c.bf16 %v60_v6, %v59_v5  ;;  %v91_v9 = vld [vmem:[%s2437_s3 + $0x100] sm:$0xff]  ;;  %v92_v10 = vld [vmem:[%s2437_s3 + $0x108] sm:$0xff]  ;;  %1436 = vmatprep.subr.bf16.mxu0 %v1435_v3  ;;  %v109_v14 = vld [vmem:[%s2437_s3 + $0x190] sm:$0xff]  ;;  %v1439_v16 = vpack.c.bf16 %v78_v13, %v77_v11 }
   0x9   :  { %v1469_v12 = vpack.c.bf16 %v92_v10, %v91_v9  ;;  %v110_v15 = vld [vmem:[%s2437_s3 + $0x198] sm:$0xff]  ;;  %1468 = vmatprep.subr.bf16.mxu1 %v1467_v7  ;;  %v61_v18 = vld [vmem:[%s2437_s3 + $0x10] sm:$0xff]  ;;  %v79_v23 = vld [vmem:[%s2437_s3 + $0xa0] sm:$0xff] }
   0xa   :  { %1438 = vmatpush3.bf16.msra.mxu0 %v1437_v8  ;;  %v1471_v17 = vpack.c.bf16 %v110_v15, %v109_v14  ;;  %v62_v19 = vld [vmem:[%s2437_s3 + $0x18] sm:$0xff]  ;;  %v93_v20 = vld [vmem:[%s2437_s3 + $0x110] sm:$0xff]  ;;  %v80_v24 = vld [vmem:[%s2437_s3 + $0xa8] sm:$0xff] }
   0xb   :  { %1470 = vmatpush3.bf16.msra.mxu1 %v1469_v12  ;;  %v1441_v21 = vpack.c.bf16 %v62_v19, %v61_v18  ;;  %v94_v22 = vld [vmem:[%s2437_s3 + $0x118] sm:$0xff]  ;;  %1440 = vmatprep.subr.bf16.mxu0 %v1439_v16  ;;  %v1443_v26 = vpack.c.bf16 %v80_v24, %v79_v23  ;;  %v111_v27 = vld [vmem:[%s2437_s3 + $0x1a0] sm:$0xff]  ;;  %v112_v28 = vld [vmem:[%s2437_s3 + $0x1a8] sm:$0xff] }
   0xc   :  { %1472 = vmatprep.subr.bf16.mxu1 %v1471_v17  ;;  %v1473_v25 = vpack.c.bf16 %v94_v22, %v93_v20  ;;  %v63_v29 = vld [vmem:[%s2437_s3 + $0x20] sm:$0xff]  ;;  %v1475_v30 = vpack.c.bf16 %v112_v28, %v111_v27  ;;  %v64_v31 = vld [vmem:[%s2437_s3 + $0x28] sm:$0xff]  ;;  %v81_v35 = vld [vmem:[%s2437_s3 + $0xb0] sm:$0xff] }
   0xd   :  { %v95_v32 = vld [vmem:[%s2437_s3 + $0x120] sm:$0xff]  ;;  %v96_v33 = vld [vmem:[%s2437_s3 + $0x128] sm:$0xff]  ;;  %v1445_v34 = vpack.c.bf16 %v64_v31, %v63_v29  ;;  %v82_v36 = vld [vmem:[%s2437_s3 + $0xb8] sm:$0xff] }
   0xe   :  { %1442 = vmatpush3.bf16.msra.mxu0 %v1441_v21  ;;  %v113_v37 = vld [vmem:[%s2437_s3 + $0x1b0] sm:$0xff]  ;;  %v1477_v38 = vpack.c.bf16 %v96_v33, %v95_v32  ;;  %v1447_v39 = vpack.c.bf16 %v82_v36, %v81_v35  ;;  %v114_v40 = vld [vmem:[%s2437_s3 + $0x1b8] sm:$0xff]  ;;  %v83_v46 = vld [vmem:[%s2437_s3 + $0xc0] sm:$0xff] }
   0xf   :  { %1474 = vmatpush3.bf16.msra.mxu1 %v1473_v25  ;;  %1444 = vmatprep.subr.bf16.mxu0 %v1443_v26  ;;  %v65_v41 = vld [vmem:[%s2437_s3 + $0x30] sm:$0xff]  ;;  %v66_v42 = vld [vmem:[%s2437_s3 + $0x38] sm:$0xff]  ;;  %v1479_v43 = vpack.c.bf16 %v114_v40, %v113_v37  ;;  %v84_v47 = vld [vmem:[%s2437_s3 + $0xc8] sm:$0xff] }
  0x10   :  { %1476 = vmatprep.subr.bf16.mxu1 %v1475_v30  ;;  %v97_v44 = vld [vmem:[%s2437_s3 + $0x130] sm:$0xff]  ;;  %v98_v45 = vld [vmem:[%s2437_s3 + $0x138] sm:$0xff]  ;;  %v115_v48 = vld [vmem:[%s2437_s3 + $0x1c0] sm:$0xff]  ;;  %v1449_v50 = vpack.c.bf16 %v66_v42, %v65_v41  ;;  %v1451_v52 = vpack.c.bf16 %v84_v47, %v83_v46 }
  0x11   :  { %v116_v49 = vld [vmem:[%s2437_s3 + $0x1c8] sm:$0xff]  ;;  %v1481_v51 = vpack.c.bf16 %v98_v45, %v97_v44  ;;  %v67_v53 = vld [vmem:[%s2437_s3 + $0x40] sm:$0xff]  ;;  %v85_v58 = vld [vmem:[%s2437_s3 + $0xd0] sm:$0xff] }
  0x12   :  { %1446 = vmatpush3.bf16.msra.mxu0 %v1445_v34  ;;  %v68_v54 = vld [vmem:[%s2437_s3 + $0x48] sm:$0xff]  ;;  %v99_v55 = vld [vmem:[%s2437_s3 + $0x140] sm:$0xff]  ;;  %v1483_v56 = vpack.c.bf16 %v116_v49, %v115_v48  ;;  %v86_v59 = vld [vmem:[%s2437_s3 + $0xd8] sm:$0xff] }
  0x13   :  { %1478 = vmatpush3.bf16.msra.mxu1 %v1477_v38  ;;  %1448 = vmatprep.subr.bf16.mxu0 %v1447_v39  ;;  %v100_v57 = vld [vmem:[%s2437_s3 + $0x148] sm:$0xff]  ;;  %v117_v60 = vld [vmem:[%s2437_s3 + $0x1d0] sm:$0xff]  ;;  %v118_v61 = vld [vmem:[%s2437_s3 + $0x1d8] sm:$0xff]  ;;  %v1453_v62 = vpack.c.bf16 %v68_v54, %v67_v53  ;;  %v1455_v0 = vpack.c.bf16 %v86_v59, %v85_v58 }
  0x14   :  { %1480 = vmatprep.subr.bf16.mxu1 %v1479_v43  ;;  %v1485_v63 = vpack.c.bf16 %v100_v57, %v99_v55  ;;  %v69_v1 = vld [vmem:[%s2437_s3 + $0x50] sm:$0xff]  ;;  %v70_v2 = vld [vmem:[%s2437_s3 + $0x58] sm:$0xff]  ;;  %v1487_v4 = vpack.c.bf16 %v118_v61, %v117_v60  ;;  %v87_v6 = vld [vmem:[%s2437_s3 + $0xe0] sm:$0xff] }
  0x15   :  { %v101_v3 = vld [vmem:[%s2437_s3 + $0x150] sm:$0xff]  ;;  %v102_v5 = vld [vmem:[%s2437_s3 + $0x158] sm:$0xff]  ;;  %v88_v7 = vld [vmem:[%s2437_s3 + $0xe8] sm:$0xff]  ;;  %v1457_v10 = vpack.c.bf16 %v70_v2, %v69_v1 }
  0x16   :  { %1450 = vmatpush3.bf16.msra.mxu0 %v1449_v50  ;;  %v119_v8 = vld [vmem:[%s2437_s3 + $0x1e0] sm:$0xff]  ;;  %v120_v9 = vld [vmem:[%s2437_s3 + $0x1e8] sm:$0xff]  ;;  %v1489_v13 = vpack.c.bf16 %v102_v5, %v101_v3  ;;  %v1459_v14 = vpack.c.bf16 %v88_v7, %v87_v6  ;;  %v89_v20 = vld [vmem:[%s2437_s3 + $0xf0] sm:$0xff] }
  0x17   :  { %1482 = vmatpush3.bf16.msra.mxu1 %v1481_v51  ;;  %1452 = vmatprep.subr.bf16.mxu0 %v1451_v52  ;;  %v71_v11 = vld [vmem:[%s2437_s3 + $0x60] sm:$0xff]  ;;  %v72_v12 = vld [vmem:[%s2437_s3 + $0x68] sm:$0xff]  ;;  %v1491_v18 = vpack.c.bf16 %v120_v9, %v119_v8  ;;  %v90_v21 = vld [vmem:[%s2437_s3 + $0xf8] sm:$0xff] }
  0x18   :  { %1484 = vmatprep.subr.bf16.mxu1 %v1483_v56  ;;  %v103_v15 = vld [vmem:[%s2437_s3 + $0x160] sm:$0xff]  ;;  %v56_v17 = vld [vmem:[%s2457_s20 + $0x8] sm:$0xff]  ;;  %v121_v24 = vld [vmem:[%s2437_s3 + $0x1f0] sm:$0xff]  ;;  %v1461_v26 = vpack.c.bf16 %v72_v12, %v71_v11  ;;  %v1463_v28 = vpack.c.bf16 %v90_v21, %v89_v20 }
  0x19   :  { %v55_v16 = vld [vmem:[%s2457_s20] sm:$0xff]  ;;  %v104_v19 = vld [vmem:[%s2437_s3 + $0x168] sm:$0xff]  ;;  %v200_v23 = vcombine.high %v56_v17, %v56_v17  ;;  %v122_v25 = vld [vmem:[%s2437_s3 + $0x1f8] sm:$0xff] }
  0x1a   :  { %1454 = vmatpush3.bf16.msra.mxu0 %v1453_v62  ;;  %v199_v22 = vcombine.high %v55_v16, %v55_v16  ;;  %v1493_v27 = vpack.c.bf16 %v104_v19, %v103_v15  ;;  %v73_v29 = vld [vmem:[%s2437_s3 + $0x70] sm:$0xff]  ;;  %v74_v30 = vld [vmem:[%s2437_s3 + $0x78] sm:$0xff]  ;;  %v1495_v32 = vpack.c.bf16 %v122_v25, %v121_v24  ;;  %v139_v34 = vld [vmem:[%s2437_s3 + $0x280] sm:$0xff] }
  0x1b   :  { %1486 = vmatpush3.bf16.msra.mxu1 %v1485_v63  ;;  %1456 = vmatprep.subr.bf16.mxu0 %v1455_v0  ;;  %v105_v31 = vld [vmem:[%s2437_s3 + $0x170] sm:$0xff]  ;;  %v106_v33 = vld [vmem:[%s2437_s3 + $0x178] sm:$0xff]  ;;  %v140_v35 = vld [vmem:[%s2437_s3 + $0x288] sm:$0xff]  ;;  %v1465_v38 = vpack.c.bf16 %v74_v30, %v73_v29 }
  0x1c   :  { %1488 = vmatprep.subr.bf16.mxu1 %v1487_v4  ;;  %271 = vmatprep.mubr.f32.mxu0 %v199_v22  ;;  %v171_v36 = vld [vmem:[%s2437_s3 + $0x380] sm:$0xff]  ;;  %v172_v37 = vld [vmem:[%s2437_s3 + $0x388] sm:$0xff]  ;;  %v1497_v39 = vpack.c.bf16 %v106_v33, %v105_v31  ;;  %v1499_v40 = vpack.c.bf16 %v140_v35, %v139_v34  ;;  %v141_v46 = vld [vmem:[%s2437_s3 + $0x290] sm:$0xff] }
  0x1d   :  { %341 = vmatprep.mubr.f32.mxu1 %v200_v23  ;;  %v123_v41 = vld [vmem:[%s2437_s3 + $0x200] sm:$0xff]  ;;  %v124_v42 = vld [vmem:[%s2437_s3 + $0x208] sm:$0xff]  ;;  %v1531_v44 = vpack.c.bf16 %v172_v37, %v171_v36  ;;  %v142_v47 = vld [vmem:[%s2437_s3 + $0x298] sm:$0xff] }
  0x1e   :  { %1458 = vmatpush3.bf16.msra.mxu0 %v1457_v10  ;;  %v155_v43 = vld [vmem:[%s2437_s3 + $0x300] sm:$0xff]  ;;  %v156_v45 = vld [vmem:[%s2437_s3 + $0x308] sm:$0xff]  ;;  %v173_v48 = vld [vmem:[%s2437_s3 + $0x390] sm:$0xff]  ;;  %v1501_v50 = vpack.c.bf16 %v124_v42, %v123_v41  ;;  %v1503_v52 = vpack.c.bf16 %v142_v47, %v141_v46 }
  0x1f   :  { %1490 = vmatpush3.bf16.msra.mxu1 %v1489_v13  ;;  %1460 = vmatprep.subr.bf16.mxu0 %v1459_v14  ;;  %v174_v49 = vld [vmem:[%s2437_s3 + $0x398] sm:$0xff]  ;;  %v1533_v51 = vpack.c.bf16 %v156_v45, %v155_v43  ;;  %v125_v53 = vld [vmem:[%s2437_s3 + $0x210] sm:$0xff]  ;;  %v143_v58 = vld [vmem:[%s2437_s3 + $0x2a0] sm:$0xff] }
  0x20   :  { %1492 = vmatprep.subr.bf16.mxu1 %v1491_v18  ;;  %v126_v54 = vld [vmem:[%s2437_s3 + $0x218] sm:$0xff]  ;;  %v157_v55 = vld [vmem:[%s2437_s3 + $0x310] sm:$0xff]  ;;  %v1535_v56 = vpack.c.bf16 %v174_v49, %v173_v48  ;;  %v144_v59 = vld [vmem:[%s2437_s3 + $0x2a8] sm:$0xff] }
  0x21   :  { %v158_v57 = vld [vmem:[%s2437_s3 + $0x318] sm:$0xff]  ;;  %v175_v60 = vld [vmem:[%s2437_s3 + $0x3a0] sm:$0xff]  ;;  %v176_v61 = vld [vmem:[%s2437_s3 + $0x3a8] sm:$0xff]  ;;  %v1505_v62 = vpack.c.bf16 %v126_v54, %v125_v53  ;;  %v1507_v0 = vpack.c.bf16 %v144_v59, %v143_v58 }
  0x22   :  { %1462 = vmatpush3.bf16.msra.mxu0 %v1461_v26  ;;  %v1537_v63 = vpack.c.bf16 %v158_v57, %v157_v55  ;;  %v127_v1 = vld [vmem:[%s2437_s3 + $0x220] sm:$0xff]  ;;  %v128_v2 = vld [vmem:[%s2437_s3 + $0x228] sm:$0xff]  ;;  %v1539_v4 = vpack.c.bf16 %v176_v61, %v175_v60  ;;  %v145_v6 = vld [vmem:[%s2437_s3 + $0x2b0] sm:$0xff] }
  0x23   :  { %1494 = vmatpush3.bf16.msra.mxu1 %v1493_v27  ;;  %1464 = vmatprep.subr.bf16.mxu0 %v1463_v28  ;;  %v159_v3 = vld [vmem:[%s2437_s3 + $0x320] sm:$0xff]  ;;  %v160_v5 = vld [vmem:[%s2437_s3 + $0x328] sm:$0xff]  ;;  %v146_v7 = vld [vmem:[%s2437_s3 + $0x2b8] sm:$0xff]  ;;  %v1509_v10 = vpack.c.bf16 %v128_v2, %v127_v1 }
  0x24   :  { %1496 = vmatprep.subr.bf16.mxu1 %v1495_v32  ;;  %v177_v8 = vld [vmem:[%s2437_s3 + $0x3b0] sm:$0xff]  ;;  %v178_v9 = vld [vmem:[%s2437_s3 + $0x3b8] sm:$0xff]  ;;  %v1541_v12 = vpack.c.bf16 %v160_v5, %v159_v3  ;;  %v1511_v13 = vpack.c.bf16 %v146_v7, %v145_v6  ;;  %v147_v18 = vld [vmem:[%s2437_s3 + $0x2c0] sm:$0xff] }
  0x25   :  { %v129_v11 = vld [vmem:[%s2437_s3 + $0x230] sm:$0xff]  ;;  %v130_v14 = vld [vmem:[%s2437_s3 + $0x238] sm:$0xff]  ;;  %v148_v19 = vld [vmem:[%s2437_s3 + $0x2c8] sm:$0xff] }
  0x26   :  { %1466 = vmatpush3.bf16.msra.mxu0 %v1465_v38  ;;  %v161_v15 = vld [vmem:[%s2437_s3 + $0x330] sm:$0xff]  ;;  %v179_v20 = vld [vmem:[%s2437_s3 + $0x3c0] sm:$0xff]  ;;  %v180_v21 = vld [vmem:[%s2437_s3 + $0x3c8] sm:$0xff]  ;;  %v1513_v24 = vpack.c.bf16 %v130_v14, %v129_v11  ;;  %v1515_v28 = vpack.c.bf16 %v148_v19, %v147_v18 }
  0x27   :  { %1498 = vmatpush3.bf16.msra.mxu1 %v1497_v39  ;;  %1500 = vmatprep.subr.bf16.mxu0 %v1499_v40  ;;  %v2151_v22 = vld [vmem:[%s2457_s20 + $0x10] sm:$0xff]  ;;  %v2156_v23 = vld [vmem:[%s2457_s20 + $0x18] sm:$0xff]  ;;  %v131_v29 = vld [vmem:[%s2437_s3 + $0x240] sm:$0xff]  ;;  %v1547_v32 = vpack.c.bf16 %v180_v21, %v179_v20 }
  0x28   :  { %1532 = vmatprep.subr.bf16.mxu1 %v1531_v44  ;;  %v201_v25 = vcombine.high %v2151_v22, %v2151_v22  ;;  %v202_v26 = vcombine.high %v2156_v23, %v2156_v23  ;;  %v132_v30 = vld [vmem:[%s2437_s3 + $0x248] sm:$0xff]  ;;  %v163_v31 = vld [vmem:[%s2437_s3 + $0x340] sm:$0xff]  ;;  %v149_v34 = vld [vmem:[%s2437_s3 + $0x2d0] sm:$0xff] }
  0x29   :  { %272 = vmatmul.mubr.f32.vlgmr.msra.gmra.mrb[0].mxu0 %v55_v16  ;;  %v162_v16 = vld [vmem:[%s2437_s3 + $0x338] sm:$0xff]  ;;  %v164_v33 = vld [vmem:[%s2437_s3 + $0x348] sm:$0xff]  ;;  %v181_v36 = vld [vmem:[%s2437_s3 + $0x3d0] sm:$0xff]  ;;  %v1517_v38 = vpack.c.bf16 %v132_v30, %v131_v29 }
  0x2a   :  { %342 = vmatmul.mubr.f32.vlgmr.msra.gmra.mrb[0].mxu1 %v56_v17  ;;  %1502 = vmatpush3.bf16.msra.mxu0 %v1501_v50  ;;  %v1543_v17 = vpack.c.bf16 %v178_v9, %v177_v8  ;;  %v1545_v27 = vpack.c.bf16 %v162_v16, %v161_v15  ;;  %v150_v35 = vld [vmem:[%s2437_s3 + $0x2d8] sm:$0xff] }
  0x2b   :  { %1534 = vmatpush3.bf16.msra.mxu1 %v1533_v51  ;;  %1504 = vmatprep.subr.bf16.mxu0 %v1503_v52  ;;  %v182_v37 = vld [vmem:[%s2437_s3 + $0x3d8] sm:$0xff] }
  0x2c   :  { %1536 = vmatprep.subr.bf16.mxu1 %v1535_v56  ;;  %411 = vmatprep.mubr.f32.mxu0 %v201_v25 }
  0x2d   :  { %481 = vmatprep.mubr.f32.mxu1 %v202_v26 }
  0x2e   :  { %1506 = vmatpush3.bf16.msra.mxu0 %v1505_v62 }
  0x2f   :  { %1538 = vmatpush3.bf16.msra.mxu1 %v1537_v63  ;;  %1508 = vmatprep.subr.bf16.mxu0 %v1507_v0 }
  0x30   :  { %1540 = vmatprep.subr.bf16.mxu1 %v1539_v4 }
  0x32   :  { %1510 = vmatpush3.bf16.msra.mxu0 %v1509_v10 }
  0x33   :  { %1542 = vmatpush3.bf16.msra.mxu1 %v1541_v12  ;;  %1512 = vmatprep.subr.bf16.mxu0 %v1511_v13 }
  0x34   :  { %1544 = vmatprep.subr.bf16.mxu1 %v1543_v17 }
  0x36   :  { %1514 = vmatpush3.bf16.msra.mxu0 %v1513_v24 }
  0x37   :  { %26 = vsyncpa [#allocation8], 0  ;;  %1546 = vmatpush3.bf16.msra.mxu1 %v1545_v27  ;;  %1516 = vmatprep.subr.bf16.mxu0 %v1515_v28  ;;  %v1549_v39 = vpack.c.bf16 %v164_v33, %v163_v31  ;;  %v1519_v40 = vpack.c.bf16 %v150_v35, %v149_v34  ;;  %v133_v41 = vld [vmem:[%s2437_s3 + $0x250] sm:$0xff]  ;;  %v134_v42 = vld [vmem:[%s2437_s3 + $0x258] sm:$0xff]  ;;  %v1551_v44 = vpack.c.bf16 %v182_v37, %v181_v36  ;;  %v1739_v14 = vmov 0.0|0.0   ;;  %s2458_s1 = sld [smem:[#allocation14_spill]] }
  0x38   :  { %v165_v43 = vld [vmem:[%s2437_s3 + $0x350] sm:$0xff]  ;;  %1548 = vmatprep.subr.bf16.mxu1 %v1547_v32  ;;  %v166_v45 = vld [vmem:[%s2437_s3 + $0x358] sm:$0xff]  ;;  %v151_v46 = vld [vmem:[%s2437_s3 + $0x2e0] sm:$0xff]  ;;  %v1521_v50 = vpack.c.bf16 %v134_v42, %v133_v41  ;;  %vm1740_vm0 = vmmov 0   ;;  %vm504_vm1 = vcmask 261120   ;;  %s2459_s24 = sld [smem:[#allocation15_spill]] }
  0x39   :  { %v152_v47 = vld [vmem:[%s2437_s3 + $0x2e8] sm:$0xff]  ;;  %v183_v48 = vld [vmem:[%s2437_s3 + $0x3e0] sm:$0xff]  ;;  %v1553_v51 = vpack.c.bf16 %v166_v45, %v165_v43  ;;  %v153_v58 = vld [vmem:[%s2437_s3 + $0x2f0] sm:$0xff]  ;;  %vm599_vm2 = vcmask 523264   ;;  %vm908_vm6 = vcmask 257024   ;;  %vm923_vm7 = vcmask 256000  }
  0x3a   :  { %v184_v49 = vld [vmem:[%s2437_s3 + $0x3e8] sm:$0xff]  ;;  %1518 = vmatpush3.bf16.msra.mxu0 %v1517_v38  ;;  %v1523_v52 = vpack.c.bf16 %v152_v47, %v151_v46  ;;  %v135_v53 = vld [vmem:[%s2437_s3 + $0x260] sm:$0xff]  ;;  %v154_v59 = vld [vmem:[%s2437_s3 + $0x2f8] sm:$0xff]  ;;  %vm938_vm8 = vcmask 258048  }
  0x3b   :  { %1550 = vmatpush3.bf16.msra.mxu1 %v1549_v39  ;;  %1520 = vmatprep.subr.bf16.mxu0 %v1519_v40  ;;  %v136_v54 = vld [vmem:[%s2437_s3 + $0x268] sm:$0xff]  ;;  %v167_v55 = vld [vmem:[%s2437_s3 + $0x360] sm:$0xff]  ;;  %v1555_v56 = vpack.c.bf16 %v184_v49, %v183_v48  ;;  %v185_v60 = vld [vmem:[%s2437_s3 + $0x3f0] sm:$0xff]  ;;  %v1527_v0 = vpack.c.bf16 %v154_v59, %v153_v58 }
  0x3c   :  { %1552 = vmatprep.subr.bf16.mxu1 %v1551_v44  ;;  %v168_v57 = vld [vmem:[%s2437_s3 + $0x368] sm:$0xff]  ;;  %v186_v61 = vld [vmem:[%s2437_s3 + $0x3f8] sm:$0xff]  ;;  %v1525_v62 = vpack.c.bf16 %v136_v54, %v135_v53  ;;  %v137_v1 = vld [vmem:[%s2437_s3 + $0x270] sm:$0xff] }
  0x3d   :  { %v1557_v63 = vpack.c.bf16 %v168_v57, %v167_v55  ;;  %v138_v2 = vld [vmem:[%s2437_s3 + $0x278] sm:$0xff]  ;;  %v1559_v3 = vpack.c.bf16 %v186_v61, %v185_v60  ;;  %v169_v4 = vld [vmem:[%s2437_s3 + $0x370] sm:$0xff]  ;;  %v492_v8 = vld [vmem:[%s2439_s5] sm:$0xff] }
  0x3e   :  { %1522 = vmatpush3.bf16.msra.mxu0 %v1521_v50  ;;  %v170_v5 = vld [vmem:[%s2437_s3 + $0x378] sm:$0xff]  ;;  %v1529_v6 = vpack.c.bf16 %v138_v2, %v137_v1  ;;  %v493_v9 = vld [vmem:[%s2439_s5 + $0x8] sm:$0xff]  ;;  %v583_v10 = vld [vmem:[%s2441_s7] sm:$0xff] }
  0x3f   :  { %1554 = vmatpush3.bf16.msra.mxu1 %v1553_v51  ;;  %1524 = vmatprep.subr.bf16.mxu0 %v1523_v52  ;;  %v1561_v7 = vpack.c.bf16 %v170_v5, %v169_v4  ;;  %v584_v11 = vld [vmem:[%s2441_s7 + $0x8] sm:$0xff]  ;;  %v1564_v12 = vpack.c.bf16 %v493_v9, %v492_v8  ;;  %v494_v15 = vld [vmem:[%s2439_s5 + $0x10] sm:$0xff]  ;;  %v495_v16 = vld [vmem:[%s2439_s5 + $0x18] sm:$0xff] }
  0x40   :  { %1556 = vmatprep.subr.bf16.mxu1 %v1555_v56  ;;  %v1570_v13 = vpack.c.bf16 %v584_v11, %v583_v10  ;;  %v585_v17 = vld [vmem:[%s2441_s7 + $0x10] sm:$0xff]  ;;  %v586_v18 = vld [vmem:[%s2441_s7 + $0x18] sm:$0xff]  ;;  %v1567_v19 = vpack.c.bf16 %v495_v16, %v494_v15  ;;  %v587_v21 = vld [vmem:[%s2441_s7 + $0x20] sm:$0xff] }
  0x41   :  { %v1573_v20 = vpack.c.bf16 %v586_v18, %v585_v17  ;;  %v588_v24 = vld [vmem:[%s2441_s7 + $0x28] sm:$0xff]  ;;  %v589_v26 = vld [vmem:[%s2441_s7 + $0x30] sm:$0xff]  ;;  %v590_v27 = vld [vmem:[%s2441_s7 + $0x38] sm:$0xff] }
  0x42   :  { %1526 = vmatpush3.bf16.msra.mxu0 %v1525_v62  ;;  %v1576_v25 = vpack.c.bf16 %v588_v24, %v587_v21  ;;  %v1579_v28 = vpack.c.bf16 %v590_v27, %v589_v26  ;;  %v582_v29 = vld [vmem:[%s2459_s24] sm:$0x1f]  ;;  %v678_v31 = vld [vmem:[%s2443_s9 + $0x8] sm:$0xff]  ;;  %v679_v33 = vld [vmem:[%s2443_s9 + $0x10] sm:$0xff] }
  0x43   :  { %1558 = vmatpush3.bf16.msra.mxu1 %v1557_v63  ;;  %1528 = vmatprep.subr.bf16.mxu0 %v1527_v0  ;;  %v677_v30 = vld [vmem:[%s2443_s9] sm:$0xff]  ;;  %v680_v34 = vld [vmem:[%s2443_s9 + $0x18] sm:$0xff] }
  0x44   :  { %1560 = vmatprep.subr.bf16.mxu1 %v1559_v3  ;;  %v1582_v32 = vpack.c.bf16 %v678_v31, %v677_v30  ;;  %v1585_v35 = vpack.c.bf16 %v680_v34, %v679_v33  ;;  %v1176_v38 = vld [vmem:[%s2438_s4] ss:$0 sm:$0xff] }
  0x45   :  { %v188_v52 = vld [vmem:[%s2445_s11] sm:$0xf] }
  0x46   :  { %1530 = vmatpush3.bf16.msra.mxu0 %v1529_v6  ;;  %v1177_v54 = vld [vmem:[%s2440_s6] ss:$0 sm:$0xff]  ;;  %vm488_vm3 = vcmp.ge.f32.partialorder %v188_v52, 0.1 }
  0x47   :  { %1562 = vmatpush3.bf16.msra.mxu1 %v1561_v7  ;;  %1563 = vmatprep.subr.bf16.mxu0 %v1739_v14  ;;  %v497_v62 = vld [vmem:[%s2446_s12] sm:$0x7] }
  0x48   :  { %1569 = vmatprep.subr.bf16.mxu1 %v1739_v14  ;;  %v1179_v0 = vld [vmem:[%s2442_s8] ss:$0 sm:$0xff]  ;;  %vm579_vm4 = vcmp.ge.f32.partialorder %v497_v62, 0.1 }
  0x49   :  { %412 = vmatmul.mubr.f32.vlgmr.msra.gmra.mrb[2].mxu0 %v2151_v22  ;;  %v1741_v22 = vmov 0.0   ;;  %v592_v2 = vld [vmem:[%s2447_s13] sm:$0x1f] }
  0x4a   :  { %482 = vmatmul.mubr.f32.vlgmr.msra.gmra.mrb[2].mxu1 %v2156_v23  ;;  %1565 = vmatpush3.bf16.msra.mxu0 %v1564_v12  ;;  %v491_v23 = vld [vmem:[%s2458_s1] sm:$0x7]  ;;  %vm674_vm5 = vcmp.ge.f32.partialorder %v592_v2, 0.1 }
  0x4b   :  { %1571 = vmatpush3.bf16.msra.mxu1 %v1570_v13  ;;  %1566 = vmatprep.subr.bf16.mxu0 %v1739_v14  ;;  %v1181_v9 = vld [vmem:[%s2444_s10] ss:$0 sm:$0xff]  ;;  %s1742_s10 = smov [#allocation7]  }
  0x4c   :  { %1572 = vmatprep.subr.bf16.mxu1 %v1739_v14  ;;  %1389 = vmatprep.mubr.msk.f32.mxu1 %vm1740_vm0, %v1741_v22  ;;  %s1144_s13 = sshll.u32 %s1742_s10, 4  ;;  %s1145_s13 = int_to_ptr.vmem [resolvable:$true] %s1144_s13 }
  0x4d   :  { %1370 = vmatprep.mubr.msk.f32.mxu0 %vm1740_vm0, %v1741_v22  ;;  %s1623_s23 = scalar_lea.vmem %s1145_s13, 64  ;;  %p1628_p1 = scmp.lt.s32.totalorder %s1145_s13, %s1145_s13 }
  0x4e   :  { %1568 = vmatpush3.bf16.msra.mxu0 %v1567_v19  ;;  %p1624_p0 = scmp.ne.s32.totalorder %s1145_s13, %s1623_s23  ;;  %p1629_p2 = scmp.lt.s32.totalorder %s1623_s23, %s1623_s23 }
  0x4f   :  { %1574 = vmatpush3.bf16.msra.mxu1 %v1573_v20  ;;  %1581 = vmatprep.subr.bf16.mxu0 %v1739_v14 }
  0x50   :  { %1575 = vmatprep.subr.bf16.mxu1 %v1739_v14  ;;  %p1630_p3 = por %p1629_p2, %p1628_p1 }
  0x51   :  { %1371 = vmatmul.mubr.msk.f32.vlgmr.msra.gmra.mrb[4].mxu0 %vm504_vm1, %v491_v23 }
  0x52   :  { %1400 = vmatprep.mubr.msk.f32.mxu0 %vm1740_vm0, %v1741_v22  ;;  %1583 = vmatpush3.bf16.msra.mxu0 %v1582_v32  ;;  %p1631_p4 = pnand %p1630_p3, %p1624_p0 }
  0x53   :  { %1577 = vmatpush3.bf16.msra.mxu1 %v1576_v25  ;;  %1584 = vmatprep.subr.bf16.mxu0 %v1739_v14 }
  0x54   :  { %1578 = vmatprep.subr.bf16.mxu1 %v1739_v14 }
  0x56   :  { %1586 = vmatpush3.bf16.msra.mxu0 %v1585_v35 }
  0x57   :  { %1580 = vmatpush3.bf16.msra.mxu1 %v1579_v28  ;;  %1587 = vmatprep.subr.bf16.mxu0 %v1739_v14 }
  0x58   :  { %1593 = vmatprep.subr.bf16.mxu1 %v1739_v14 }
  0x5a   :  { %1390 = vmatmul.mubr.msk.f32.vlgmr.msra.gmra.mrb[4].mxu1 %vm599_vm2, %v582_v29 }
  0x5b   :  { %1422 = vmatprep.mubr.msk.f32.mxu1 %vm1740_vm0, %v1741_v22  ;;  %1595 = vmatpush3.bf16.msra.mxu1 %v1582_v32 }
  0x5c   :  { %1596 = vmatprep.subr.bf16.mxu1 %v1739_v14 }
  0x5f   :  { %1598 = vmatpush3.bf16.msra.mxu1 %v1585_v35 }
  0x60   :  { %1430 = vmatprep.subr.mxu1 %v1741_v22 }
  0xfc   :  { %v1221_v36 = vpop.f32.mrb[0].mxu0 }
  0xfd   :  { %v1256_v37 = vpop.f32.mrb[0].mxu1  ;;  %v1222_v39 = vpop.f32.mrb[1].mxu0 }
  0xfe   :  { %v1223_v40 = vadd.f32 %v1222_v39, %v1221_v36  ;;  %v1257_v41 = vpop.f32.mrb[1].mxu1 }
  0xff   :  { %v1258_v42 = vadd.f32 %v1257_v41, %v1256_v37 }
 0x100   :  { %v274_v43 = vadd.f32 %v1223_v40, %v1176_v38 }
 0x102   :  { %v344_v44 = vadd.f32 %v1258_v42, %v274_v43 }
 0x11c   :  { %v1291_v45 = vpop.f32.mrb[2].mxu0 }
 0x11d   :  { %v1326_v46 = vpop.f32.mrb[2].mxu1  ;;  %v1292_v47 = vpop.f32.mrb[3].mxu0 }
 0x11e   :  { %v1293_v48 = vadd.f32 %v1292_v47, %v1291_v45  ;;  %v1327_v49 = vpop.f32.mrb[3].mxu1 }
 0x11f   :  { %v1328_v50 = vadd.f32 %v1327_v49, %v1326_v46 }
 0x120   :  { %v414_v51 = vadd.f32 %v1293_v48, %v344_v44 }
 0x122   :  { %v484_v53 = vadd.f32 %v1328_v50, %v414_v51 }
 0x124   :  { %v487_v55 = vmax.f32 %v484_v53, 0.0  ;;  %v574_v56 = vpop.f32.mrb[4].mxu0 }
 0x125   :  { %v575_v57 = vadd.f32 %v1177_v54, %v574_v56  ;;  %v1372_v58 = vpop.f32.mrb[5].mxu0 }
 0x126   :  { %v489_v59 = vmul.f32 1.1111112, %v487_v55 }
 0x127   :  { %v578_v60 = vmax.f32 %v575_v57, 0.0 }
 0x128   :  { %v490_v61 = vsel %vm488_vm3, %v489_v59, 0.0 }
 0x129   :  { %1401 = vmatmul.mubr.msk.f32.vlgmr.msra.gmra.mrb[6].mxu0 %vm504_vm1, %v490_v61  ;;  %v580_v63 = vmul.f32 1.1111112, %v578_v60 }
 0x12a   :  { %1589 = vmatpush3.bf16.msra.mxu0 %v1582_v32  ;;  %1411 = vmatprep.mubr.msk.f32.mxu0 %vm1740_vm0, %v1741_v22 }
 0x12b   :  { %1590 = vmatprep.subr.bf16.mxu0 %v1739_v14  ;;  %v581_v5 = vsel %vm579_vm4, %v580_v63, 0.0 }
 0x12d   :  { %v669_v1 = vpop.f32.mrb[4].mxu1 }
 0x12e   :  { %v670_v3 = vadd.f32 %v1179_v0, %v669_v1  ;;  %v1391_v4 = vpop.f32.mrb[5].mxu1  ;;  %1592 = vmatpush3.bf16.msra.mxu0 %v1585_v35 }
 0x12f   :  { %1425 = vmatprep.subr.mxu0 %v1741_v22 }
 0x130   :  { %v673_v6 = vmax.f32 %v670_v3, 0.0 }
 0x131   :  { %1412 = vmatmul.mubr.msk.f32.vlgmr.msra.gmra.mrb[8].mxu0 %vm504_vm1, %v581_v5 }
 0x132   :  { %v675_v7 = vmul.f32 1.1111112, %v673_v6  ;;  %1427 = vmatprep.mubr.msk.f32.mxu0 %vm1740_vm0, %v1741_v22 }
 0x134   :  { %v676_v8 = vsel %vm674_vm5, %v675_v7, 0.0 }
 0x135   :  { %1423 = vmatmul.mubr.msk.f32.vlgmr.msra.gmra.mrb[6].mxu1 %vm504_vm1, %v676_v8 }
 0x136   :  { %1432 = vmatprep.mubr.msk.f32.mxu1 %vm1740_vm0, %v1741_v22 }
 0x1fc   :  { %v757_v10 = vpop.f32.mrb[6].mxu0 }
 0x1fd   :  { %v758_v11 = vadd.f32 %v1181_v9, %v757_v10  ;;  %v1402_v12 = vpop.f32.mrb[7].mxu0 }
 0x1ff   :  { %v907_v13 = vmul.f32 %v758_v11, %v758_v11  ;;  %1105 = vst.msk [vmem:[#allocation6] sm:$0xf] %vm908_vm6, %v758_v11 }
 0x201   :  { %v909_v14 = vsel %vm908_vm6, %v907_v13, 0.0 }
 0x202   :  { %910 = vadd.xlane.f32.xlu1 %v909_v14 }
 0x204   :  { %v830_v15 = vpop.f32.mrb[8].mxu0 }
 0x205   :  { %v831_v16 = vadd.f32 %v1181_v9, %v830_v15  ;;  %v1413_v17 = vpop.f32.mrb[9].mxu0 }
 0x207   :  { %1106 = vst.msk [vmem:[#allocation7] sm:$0x7] %vm923_vm7, %v831_v16  ;;  %v922_v24 = vmul.f32 %v831_v16, %v831_v16 }
 0x208   :  { %v903_v18 = vpop.f32.mrb[6].mxu1 }
 0x209   :  { %v904_v19 = vadd.f32 %v1181_v9, %v903_v18  ;;  %v1424_v20 = vpop.f32.mrb[7].mxu1  ;;  %v924_v23 = vsel %vm923_vm7, %v922_v24, 0.0 }
 0x20b   :  { %v937_v21 = vmul.f32 %v904_v19, %v904_v19  ;;  %1107 = vst.msk [vmem:[#allocation9] sm:$0x1f] %vm938_vm8, %v904_v19 }
 0x20d   :  { %v939_v22 = vsel %vm938_vm8, %v937_v21, 0.0 }
 0x20e   :  { %940 = vadd.xlane.f32.xlu0 %v939_v22 }
 0x212   :  { %925 = vadd.xlane.f32.xlu0 %v924_v23 }
 0x28f   :  { %v911_v25 = vpop.xlane.xlu1 %910 }
 0x290   :  { %1611 = vrsqrt.f32 %v911_v25  ;;  %vm914_vm9 = vcmp.eq.f32.partialorder %v911_v25, inf  ;;  %v917_v31 = vand.u32 2147483648, %v911_v25  ;;  %vm916_vm10 = vcmp.eq.f32.partialorder %v911_v25, 0.0 }
 0x29a   :  { %v1612_v27 = vpop.eup %1611 }
 0x29b   :  { %v941_v26 = vpop.xlane.xlu0 %940  ;;  %v913_v29 = vmul.f32 %v1612_v27, %v911_v25 }
 0x29c   :  { %1613 = vrsqrt.f32 %v941_v26  ;;  %vm944_vm11 = vcmp.eq.f32.partialorder %v941_v26, inf  ;;  %v947_v35 = vand.u32 2147483648, %v941_v26  ;;  %vm946_vm12 = vcmp.eq.f32.partialorder %v941_v26, 0.0 }
 0x29d   :  { %v915_v30 = vsel %vm914_vm9, %v911_v25, %v913_v29 }
 0x29e   :  { %v918_v33 = vsel %vm916_vm10, %v917_v31, %v915_v30 }
 0x29f   :  { %v926_v28 = vpop.xlane.xlu0 %925  ;;  %v919_v38 = vadd.f32 1e-08, %v918_v33 }
 0x2a0   :  { %1615 = vrsqrt.f32 %v926_v28  ;;  %vm929_vm13 = vcmp.eq.f32.partialorder %v926_v28, inf  ;;  %v932_v42 = vand.u32 2147483648, %v926_v28  ;;  %vm931_vm14 = vcmp.eq.f32.partialorder %v926_v28, 0.0 }
 0x2a6   :  { %v1614_v32 = vpop.eup %1613 }
 0x2a7   :  { %v943_v34 = vmul.f32 %v1614_v32, %v941_v26 }
 0x2a9   :  { %v945_v36 = vsel %vm944_vm11, %v941_v26, %v943_v34 }
 0x2aa   :  { %v1616_v37 = vpop.eup %1615  ;;  %v948_v39 = vsel %vm946_vm12, %v947_v35, %v945_v36 }
 0x2ab   :  { %v949_v40 = vadd.f32 1e-08, %v948_v39  ;;  %v928_v41 = vmul.f32 %v1616_v37, %v926_v28 }
 0x2ad   :  { %1617 = vrcp.f32 %v949_v40  ;;  %v930_v43 = vsel %vm929_vm13, %v926_v28, %v928_v41 }
 0x2ae   :  { %1619 = vrcp.f32 %v919_v38  ;;  %v933_v44 = vsel %vm931_vm14, %v932_v42, %v930_v43 }
 0x2af   :  { %v934_v45 = vadd.f32 1e-08, %v933_v44 }
 0x2b1   :  { %1621 = vrcp.f32 %v934_v45 }
 0x2b7   :  { %v1618_v46 = vpop.eup %1617 }
 0x2b8   :  { %v1620_v47 = vpop.eup %1619  ;;  %v951_v48 = vmul.f32 %v1618_v46, %v904_v19 }
 0x2b9   :  { %v921_v50 = vmul.f32 %v1620_v47, %v758_v11 }
 0x2ba   :  { %1431 = vmatpush3.xpose.msk.msra.mxu1 %vm504_vm1, %v951_v48 }
 0x2bb   :  { %v1622_v49 = vpop.eup %1621 }
 0x2bc   :  { %v936_v51 = vmul.f32 %v1622_v49, %v831_v16 }
 0x2bd   :  { %1433 = vmatmul.mubr.msk.f32.vlgmr.msra.gmra.mrb[8].mxu1 %vm504_vm1, %v921_v50 }
 0x2be   :  { %1426 = vmatpush3.xpose.msk.msra.mxu0 %vm504_vm1, %v936_v51 }
 0x2c1   :  { %1428 = vmatmul.mubr.msk.f32.vlgmr.msra.gmra.mrb[10].mxu0 %vm504_vm1, %v921_v50 }
 0x2c2   :  { %1634 = shalt.err (!%p1631_p4)
}
 0x2c3   :  { %s1635_s25 = scalar_lea.hbm %s2451_s17, 64 }
 0x2c4   :  { %p1636_p5 = scmp.ne.s32.totalorder %s2451_s17, %s1635_s25  ;;  %p1639_p6 = scmp.lt.u32.totalorder %s1635_s25, %s2451_s17 }
 0x2c6   :  { %p1641_p7 = pnand %p1639_p6, %p1636_p5 }
 0x2c8   :  { %1644 = shalt.err (!%p1641_p7)
}
 0x2c9   :  { %1147 = dma.vmem_to_hbm [thread:$0]  %s1145_s13, 64, %s2451_s17, [#allocation8]  }
 0x2ca   :  { %s1743_s0 = smov [#allocation9]  }
 0x2cb   :  { %s1154_s19 = sshll.u32 %s1743_s0, 4  ;;  %s1155_s19 = int_to_ptr.vmem [resolvable:$true] %s1154_s19 }
 0x2cc   :  { %s1645_s9 = scalar_lea.vmem %s1155_s19, 128  ;;  %p1650_p9 = scmp.lt.s32.totalorder %s1155_s19, %s1155_s19 }
 0x2cd   :  { %p1646_p8 = scmp.ne.s32.totalorder %s1155_s19, %s1645_s9  ;;  %p1651_p10 = scmp.lt.s32.totalorder %s1645_s9, %s1645_s9 }
 0x2cf   :  { %p1652_p11 = por %p1651_p10, %p1650_p9 }
 0x2d1   :  { %p1653_p12 = pnand %p1652_p11, %p1646_p8 }
 0x2d3   :  { %1656 = shalt.err (!%p1653_p12)
}
 0x2d4   :  { %s1657_s4 = scalar_lea.hbm %s2452_s18, 128 }
 0x2d5   :  { %p1658_p13 = scmp.ne.s32.totalorder %s2452_s18, %s1657_s4  ;;  %p1661_p0 = scmp.lt.u32.totalorder %s1657_s4, %s2452_s18 }
 0x2d7   :  { %p1663_p1 = pnand %p1661_p0, %p1658_p13 }
 0x2d9   :  { %1666 = shalt.err (!%p1663_p1)
}
 0x2da   :  { %1157 = dma.vmem_to_hbm [thread:$0]  %s1155_s19, 128, %s2452_s18, [#allocation8]   ;;  %vm1103_vm15 = vcmask 35840  }
 0x2db   :  { %s1744_s2 = smov [#allocation4]   ;;  %s1745_s12 = smov [#allocation6]  }
 0x2dc   :  { %s1124_s8 = sshll.u32 %s1744_s2, 4  ;;  %s1134_s10 = sshll.u32 %s1745_s12, 4  ;;  %s1125_s8 = int_to_ptr.vmem [resolvable:$true] %s1124_s8  ;;  %s2383_s10 = int_to_ptr.vmem [resolvable:$true] %s1134_s10 }
 0x2dd   :  { %s1746_s13 = smov [#allocation2]   ;;  %s1667_s24 = scalar_lea.vmem %s1125_s8, 64 }
 0x2de   :  { %s1114_s23 = sshll.u32 %s1746_s13, 4  ;;  %p1668_p2 = scmp.ne.s32.totalorder %s1125_s8, %s1667_s24  ;;  %s2385_s23 = int_to_ptr.vmem [resolvable:$true] %s1114_s23 }
 0x2df   :  { %p1672_p3 = scmp.lt.s32.totalorder %s1125_s8, %s1125_s8  ;;  %p1673_p4 = scmp.lt.s32.totalorder %s1667_s24, %s1667_s24 }
 0x2e1   :  { %p1674_p5 = por %p1673_p4, %p1672_p3 }
 0x2e3   :  { %p1675_p6 = pnand %p1674_p5, %p1668_p2 }
 0x390   :  { %v1099_v52 = vpop.f32.mrb[8].mxu1 }
 0x391   :  { %v1434_v53 = vpop.f32.mrb[9].mxu1  ;;  %1104 = vst.msk [vmem:[#allocation4] sm:$0xf] %vm1103_vm15, %v1099_v52 }
 0x392   :  { %1678 = shalt.err (!%p1675_p6)
}
 0x393   :  { %s1679_s25 = scalar_lea.hbm %s2449_s15, 64 }
 0x394   :  { %p1680_p7 = scmp.ne.s32.totalorder %s2449_s15, %s1679_s25  ;;  %p1683_p8 = scmp.lt.u32.totalorder %s1679_s25, %s2449_s15 }
 0x396   :  { %p1685_p9 = pnand %p1683_p8, %p1680_p7 }
 0x398   :  { %1688 = shalt.err (!%p1685_p9)
}
 0x399   :  { %1127 = dma.vmem_to_hbm [thread:$0]  %s1125_s8, 64, %s2449_s15, [#allocation5]   ;;  %vm1028_vm0 = vcmask 19456  }
 0x39a   :  { %s1689_s0 = scalar_lea.vmem %s2383_s10, 64  ;;  %p1694_p11 = scmp.lt.s32.totalorder %s2383_s10, %s2383_s10 }
 0x39b   :  { %p1690_p10 = scmp.ne.s32.totalorder %s2383_s10, %s1689_s0  ;;  %p1695_p12 = scmp.lt.s32.totalorder %s1689_s0, %s1689_s0 }
 0x39d   :  { %p1696_p13 = por %p1695_p12, %p1694_p11 }
 0x39f   :  { %p1697_p0 = pnand %p1696_p13, %p1690_p10 }
 0x3a1   :  { %1700 = shalt.err (!%p1697_p0)
}
 0x3a2   :  { %s1701_s1 = scalar_lea.hbm %s2450_s16, 64 }
 0x3a3   :  { %p1702_p1 = scmp.ne.s32.totalorder %s2450_s16, %s1701_s1  ;;  %p1705_p2 = scmp.lt.u32.totalorder %s1701_s1, %s2450_s16 }
 0x3a5   :  { %p1707_p3 = pnand %p1705_p2, %p1702_p1 }
 0x3a7   :  { %1710 = shalt.err (!%p1707_p3)
}
 0x3a8   :  { %1137 = dma.vmem_to_hbm [thread:$0]  %s2383_s10, 64, %s2450_s16, [#allocation5]   ;;  %v1024_v54 = vpop.f32.mrb[10].mxu0 }
 0x3a9   :  { %v1429_v55 = vpop.f32.mrb[11].mxu0  ;;  %1029 = vst.msk [vmem:[#allocation2] sm:$0xf] %vm1028_vm0, %v1024_v54  ;;  %s1711_s17 = scalar_lea.vmem %s2385_s23, 64  ;;  %p1716_p5 = scmp.lt.s32.totalorder %s2385_s23, %s2385_s23 }
 0x3aa   :  { %p1712_p4 = scmp.ne.s32.totalorder %s2385_s23, %s1711_s17  ;;  %p1717_p6 = scmp.lt.s32.totalorder %s1711_s17, %s1711_s17 }
 0x3ac   :  { %p1718_p7 = por %p1717_p6, %p1716_p5 }
 0x3ae   :  { %p1719_p8 = pnand %p1718_p7, %p1712_p4 }
 0x3b0   :  { %1722 = shalt.err (!%p1719_p8)
}
 0x3b1   :  { %s1723_s2 = scalar_lea.hbm %s2448_s14, 64 }
 0x3b2   :  { %p1724_p9 = scmp.ne.s32.totalorder %s2448_s14, %s1723_s2  ;;  %p1727_p10 = scmp.lt.u32.totalorder %s1723_s2, %s2448_s14 }
 0x3b4   :  { %p1729_p11 = pnand %p1727_p10, %p1724_p9 }
 0x3b6   :  { %1732 = shalt.err (!%p1729_p11)
}
 0x3b7   :  { %1117 = dma.vmem_to_hbm [thread:$0]  %s2385_s23, 64, %s2448_s14, [#allocation3]  }
 0x3b8   :  { %1733 = dma.done.wait [#allocation3], 64  }
 0x3b9   :  { %1734 = vsyncadd [#allocation3], 4294967232 }
 0x3ba   :  { %1735 = dma.done.wait [#allocation5], 128  }
 0x3bb   :  { %1736 = vsyncadd [#allocation5], 4294967168 }
 0x3bc   :  { %1737 = dma.done.wait [#allocation8], 192  }
 0x3bd   :  { %1738 = vsyncadd [#allocation8], 4294967104 }
 0x3be   :  { %1173 = vsyncpa [#allocation3], 1 }
 0x3bf   :  { %1174 = vsyncpa [#allocation5], 1 }
 0x3c0   :  { %1175 = vsyncpa [#allocation8], 1 }

</bundles_post_ra>
